<compile_context>
chip_gen: v7x
topology: tpu7x:2x2x1
jax: 0.10.0
libtpu: 0.0.40
codegen_flags: <defaults>
</compile_context>

<pallas_src>
from typing import NamedTuple, Optional

import jax
import jax.numpy as jnp
from jax.experimental import pallas as pl
from jax.experimental.pallas import tpu as pltpu


class Mixture(NamedTuple):
    positions: jax.Array
    weights: jax.Array
    batch: Optional[jax.Array] = None


def _round_up(x: int, m: int) -> int:
    return ((x + m - 1) // m) * m


def _lane_pad(n: int) -> int:
    return _round_up(max(int(n), 1), 128)


def _sub_pad(n: int) -> int:
    return _round_up(max(int(n), 1), 8)


def _kernel_conv_kernel(
    in_pos_ref,    # (tm, D)       input positions tile (streamed)
    in_w_ref,      # (tm, F)       input weights tile   (streamed)
    pos_sel_ref,   # (D, J*D)      coordinate replication matrix (resident)
    k_pos_ref,     # (1, J*D)      flattened filter kernel positions (resident)
    k_w_ref,       # (F, J*G)      flattened filter weights (resident)
    out_pos_ref,   # (tm, J*D)     output positions tile (lane-dense)
    out_w_ref,     # (tm, J*G)     output weights tile   (lane-dense)
):
    # Weights: einsum('if,jfg->ijg') == (tm, F) @ (F, J*G) on the MXU.
    out_w_ref[...] = jnp.dot(
        in_w_ref[...],
        k_w_ref[...],
        preferred_element_type=jnp.float32,
    ).astype(out_w_ref.dtype)

    # Positions: replicate each input coordinate into its j-slot with a tiny
    # selection matmul (exact: multiplies by 1.0), then add the flattened
    # kernel offsets broadcast over rows (sublane broadcast on the VPU).
    rep = jnp.dot(
        in_pos_ref[...],
        pos_sel_ref[...],
        preferred_element_type=jnp.float32,
    )
    out_pos_ref[...] = (rep + k_pos_ref[...]).astype(out_pos_ref.dtype)


def kernel_conv_pallas(
    input_mixture: Mixture,
    kernel_positions: jax.Array,   # (J, D)
    kernel_weights: jax.Array,     # (J, F, G)
    *,
    tm: int = 512,
) -> Mixture:
    in_pos, in_w, in_batch = input_mixture
    N, D = in_pos.shape
    J, F, G = kernel_weights.shape
    assert kernel_positions.shape == (J, D)
    assert in_w.shape == (N, F)

    bpe = 4  # f32 accounting (conservative for bf16 inputs)

    # --- Layout plumbing (host/wrapper side) --------------------------------
    # Filter weights flattened to (F, J*G): lane-dense RHS and lane-dense output.
    k_w2 = jnp.transpose(kernel_weights, (1, 0, 2)).reshape(F, J * G)
    # Flattened kernel positions (1, J*D): element (0, j*D+d) = kp[j, d].
    k_pos_flat = kernel_positions.reshape(1, J * D)
    # Selection matrix (D, J*D): pos_sel[d, j*D+d] = 1 so ip @ pos_sel puts
    # ip[n, d] at column j*D+d for every j.
    pos_sel = jnp.tile(jnp.eye(D, dtype=in_pos.dtype), (1, J))

    # --- Row tile selection --------------------------------------------------
    tm_eff = max(8, min(tm, _round_up(N, 8)))
    tm_eff = (tm_eff // 8) * 8

    def vmem_estimate(t: int) -> int:
        # Double-buffered streamed blocks, padded to the (8,128) VMEM tiling.
        streamed = 2 * t * (
            _lane_pad(D) + _lane_pad(F) + _lane_pad(J * D) + _lane_pad(J * G)
        )
        # Resident blocks (also double-buffered by the pipeline).
        resident = 2 * (
            _sub_pad(D) * _lane_pad(J * D)
            + _sub_pad(1) * _lane_pad(J * D)
            + _sub_pad(F) * _lane_pad(J * G)
        )
        return (streamed + resident) * bpe

    budget = 20 * 1024 * 1024  # leave headroom even on v7x (64 MiB physical)
    while tm_eff > 8 and vmem_estimate(tm_eff) > budget:
        tm_eff = max(8, (tm_eff // 2 // 8) * 8)

    n_pad = _round_up(N, tm_eff)
    if n_pad != N:
        in_pos_p = jnp.pad(in_pos, ((0, n_pad - N), (0, 0)))
        in_w_p = jnp.pad(in_w, ((0, n_pad - N), (0, 0)))
    else:
        in_pos_p, in_w_p = in_pos, in_w

    grid = (n_pad // tm_eff,)
    vmem_limit_bytes = int(
        min(48 * 1024 * 1024, max(32 * 1024 * 1024, 2 * vmem_estimate(tm_eff)))
    )

    out_pos2, out_w2 = pl.pallas_call(
        _kernel_conv_kernel,
        out_shape=(
            jax.ShapeDtypeStruct((n_pad, J * D), in_pos.dtype),
            jax.ShapeDtypeStruct((n_pad, J * G), in_w.dtype),
        ),
        grid_spec=pltpu.PrefetchScalarGridSpec(
            num_scalar_prefetch=0,
            grid=grid,
            in_specs=[
                pl.BlockSpec((tm_eff, D), lambda i: (i, 0)),      # input positions (streamed)
                pl.BlockSpec((tm_eff, F), lambda i: (i, 0)),      # input weights   (streamed)
                pl.BlockSpec((D, J * D), lambda i: (0, 0)),       # selection matrix (resident)
                pl.BlockSpec((1, J * D), lambda i: (0, 0)),       # kernel positions (resident)
                pl.BlockSpec((F, J * G), lambda i: (0, 0)),       # kernel weights   (resident)
            ],
            out_specs=(
                pl.BlockSpec((tm_eff, J * D), lambda i: (i, 0)),  # positions, lane-dense
                pl.BlockSpec((tm_eff, J * G), lambda i: (i, 0)),  # weights,   lane-dense
            ),
        ),
        compiler_params=pltpu.CompilerParams(
            dimension_semantics=("parallel",),
            vmem_limit_bytes=vmem_limit_bytes,
        ),
        cost_estimate=pl.CostEstimate(
            flops=2 * N * F * J * G + 2 * N * D * J * D + N * J * D,
            transcendentals=0,
            bytes_accessed=bpe
            * (N * (D + F) + J * D + F * J * G + D * J * D + N * J * (D + G)),
        ),
    )(in_pos_p, in_w_p, pos_sel, k_pos_flat, k_w2)

    # Free row-major reshapes (and drop padded rows) in the wrapper.
    out_positions = out_pos2[:N].reshape(N * J, D)
    out_weights = out_w2[:N].reshape(N * J, G)
    out_batch = None if in_batch is None else in_batch * J
    return Mixture(out_positions, out_weights, out_batch)


# ---------------------------------------------------------------------------
# Parameter construction (host-side, mirrors KernelConv.__init__; not part of
# the forward pass, done in plain JAX).
# ---------------------------------------------------------------------------
def grid_positions(max_filter_kernels: int, n_dimensions: int, kernel_spread: float = 1.0):
    n_per = int(max_filter_kernels ** (1.0 / n_dimensions))
    if n_per % 2 == 0:
        n_per -= 1
    pts = kernel_spread * jnp.linspace(n_per / 2.0, -n_per / 2.0, n_per)
    mesh = jnp.meshgrid(*([pts] * n_dimensions), indexing="ij")
    return jnp.stack(mesh, axis=-1).reshape(-1, n_dimensions)


def _reference(in_pos, in_w, k_pos, k_w):
    N, D = in_pos.shape
    J, F, G = k_w.shape
    ref_pos = (in_pos[:, None, :] + k_pos[None, :, :]).reshape(N * J, D)
    ref_w = jnp.einsum("if,jfg->ijg", in_w, k_w).reshape(N * J, G)
    return ref_pos, ref_w


if __name__ == "__main__":
    key = jax.random.PRNGKey(0)
    k1, k2, k3 = jax.random.split(key, 3)

    N = 128                  # in_kernels
    D = 2                    # n_dimensions
    F = 16                   # in_channels
    G = 32                   # out_channels
    MAX_FILTER_KERNELS = 9   # grid init -> 3 per dim -> J = 9 filter kernels

    kernel_pos = grid_positions(MAX_FILTER_KERNELS, D, kernel_spread=1.0)
    J = kernel_pos.shape[0]
    # TODO(synk): kaiming-normal init fidelity is host-side setup, not part of forward.
    kernel_w = jax.random.normal(k2, (J, F, G), dtype=jnp.float32) * (2.0 / (F * G)) ** 0.5

    in_pos = jax.random.normal(k1, (N, D), dtype=jnp.float32)
    in_w = jax.random.normal(k3, (N, F), dtype=jnp.float32)
    in_batch = jnp.array([64, 64], dtype=jnp.int32)

    mix = Mixture(positions=in_pos, weights=in_w, batch=in_batch)

    out = kernel_conv_pallas(mix, kernel_pos, kernel_w)
    out_pos = jax.block_until_ready(out.positions)
    out_w = jax.block_until_ready(out.weights)

    ref_pos, ref_w = _reference(in_pos, in_w, kernel_pos, kernel_w)

    assert out_pos.shape == (N * J, D), out_pos.shape
    assert out_w.shape == (N * J, G), out_w.shape
    assert out.batch is not None and int(out.batch[0]) == 64 * J

    pos_err = float(jnp.max(jnp.abs(out_pos - ref_pos)))
    w_err = float(jnp.max(jnp.abs(out_w - ref_w)))
    assert pos_err < 1e-5, f"position max abs err {pos_err}"
    assert w_err < 1e-3, f"weight max abs err {w_err}"

    print("KERNEL_OK")
</pallas_src>

<mosaic_0001>
module attributes {stable_mosaic.version = 11 : i64} {
  func.func @_kernel_conv_kernel(%arg0: i32, %arg1: memref<128x2xf32, #tpu.memory_space<vmem>>, %arg2: memref<128x16xf32, #tpu.memory_space<vmem>>, %arg3: memref<2x18xf32, #tpu.memory_space<vmem>>, %arg4: memref<1x18xf32, #tpu.memory_space<vmem>>, %arg5: memref<16x288xf32, #tpu.memory_space<vmem>>, %arg6: memref<128x18xf32, #tpu.memory_space<vmem>>, %arg7: memref<128x288xf32, #tpu.memory_space<vmem>>) attributes {dimension_semantics = [#tpu.dimension_semantics<parallel>], iteration_bounds = array<i64: 1>, scalar_prefetch = 0 : i64, scratch_operands = 0 : i64, tpu.core_type = #tpu.core_type<tc>, window_params = [{transform_indices = @transform_0, window_bounds = array<i64: 128, 2>}, {transform_indices = @transform_1, window_bounds = array<i64: 128, 16>}, {pipeline_mode = #tpu.pipeline_mode<synchronous>, transform_indices = @transform_2, window_bounds = array<i64: 2, 18>}, {pipeline_mode = #tpu.pipeline_mode<synchronous>, transform_indices = @transform_3, window_bounds = array<i64: 1, 18>}, {pipeline_mode = #tpu.pipeline_mode<synchronous>, transform_indices = @transform_4, window_bounds = array<i64: 16, 288>}, {transform_indices = @transform_5, window_bounds = array<i64: 128, 18>}, {transform_indices = @transform_6, window_bounds = array<i64: 128, 288>}]} {
    %c0 = arith.constant 0 : index
    %c0_0 = arith.constant 0 : index
    %0 = vector.load %arg2[%c0, %c0_0] : memref<128x16xf32, #tpu.memory_space<vmem>>, vector<128x16xf32>
    %c0_1 = arith.constant 0 : index
    %c0_2 = arith.constant 0 : index
    %1 = vector.load %arg5[%c0_1, %c0_2] : memref<16x288xf32, #tpu.memory_space<vmem>>, vector<16x288xf32>
    %cst = arith.constant dense<0.000000e+00> : vector<128x288xf32>
    %2 = tpu.matmul %0, %1, %cst {dimension_numbers = #tpu.dot_dimension_numbers<[1], [0], [0], [1], [0, 0, 1, 1], [], []>} : vector<128x16xf32>, vector<16x288xf32>, vector<128x288xf32> -> vector<128x288xf32>
    %c0_3 = arith.constant 0 : index
    %c0_4 = arith.constant 0 : index
    %3 = vector.load %arg7[%c0_3, %c0_4] : memref<128x288xf32, #tpu.memory_space<vmem>>, vector<128x288xf32>
    tpu.vector_store %arg7[%c0_3, %c0_4], %2 {strides = array<i32>} : memref<128x288xf32, #tpu.memory_space<vmem>>, vector<128x288xf32>,
    %c0_5 = arith.constant 0 : index
    %c0_6 = arith.constant 0 : index
    %4 = vector.load %arg1[%c0_5, %c0_6] : memref<128x2xf32, #tpu.memory_space<vmem>>, vector<128x2xf32>
    %c0_7 = arith.constant 0 : index
    %c0_8 = arith.constant 0 : index
    %5 = vector.load %arg3[%c0_7, %c0_8] : memref<2x18xf32, #tpu.memory_space<vmem>>, vector<2x18xf32>
    %cst_9 = arith.constant dense<0.000000e+00> : vector<128x18xf32>
    %6 = tpu.matmul %4, %5, %cst_9 {dimension_numbers = #tpu.dot_dimension_numbers<[1], [0], [0], [1], [0, 0, 1, 1], [], []>} : vector<128x2xf32>, vector<2x18xf32>, vector<128x18xf32> -> vector<128x18xf32>
    %c0_10 = arith.constant 0 : index
    %c0_11 = arith.constant 0 : index
    %7 = vector.load %arg4[%c0_10, %c0_11] : memref<1x18xf32, #tpu.memory_space<vmem>>, vector<1x18xf32>
    %8 = vector.broadcast %7 : vector<1x18xf32> to vector<128x18xf32>
    %9 = arith.addf %6, %8 : vector<128x18xf32>
    %c0_12 = arith.constant 0 : index
    %c0_13 = arith.constant 0 : index
    %10 = vector.load %arg6[%c0_12, %c0_13] : memref<128x18xf32, #tpu.memory_space<vmem>>, vector<128x18xf32>
    tpu.vector_store %arg6[%c0_12, %c0_13], %9 {strides = array<i32>} : memref<128x18xf32, #tpu.memory_space<vmem>>, vector<128x18xf32>,
    return
  }
  func.func @transform_0(%arg0: i32) -> (i32, i32) {
    %c0_i32 = arith.constant 0 : i32
    %c0_i32_0 = arith.constant 0 : i32
    return %arg0, %c0_i32 : i32, i32
  }
  func.func @transform_1(%arg0: i32) -> (i32, i32) {
    %c0_i32 = arith.constant 0 : i32
    %c0_i32_0 = arith.constant 0 : i32
    return %arg0, %c0_i32 : i32, i32
  }
  func.func @transform_2(%arg0: i32) -> (i32, i32) {
    %c0_i32 = arith.constant 0 : i32
    %c0_i32_0 = arith.constant 0 : i32
    %c0_i32_1 = arith.constant 0 : i32
    return %c0_i32, %c0_i32_0 : i32, i32
  }
  func.func @transform_3(%arg0: i32) -> (i32, i32) {
    %c0_i32 = arith.constant 0 : i32
    %c0_i32_0 = arith.constant 0 : i32
    %c0_i32_1 = arith.constant 0 : i32
    return %c0_i32, %c0_i32_0 : i32, i32
  }
  func.func @transform_4(%arg0: i32) -> (i32, i32) {
    %c0_i32 = arith.constant 0 : i32
    %c0_i32_0 = arith.constant 0 : i32
    %c0_i32_1 = arith.constant 0 : i32
    return %c0_i32, %c0_i32_0 : i32, i32
  }
  func.func @transform_5(%arg0: i32) -> (i32, i32) {
    %c0_i32 = arith.constant 0 : i32
    %c0_i32_0 = arith.constant 0 : i32
    return %arg0, %c0_i32 : i32, i32
  }
  func.func @transform_6(%arg0: i32) -> (i32, i32) {
    %c0_i32 = arith.constant 0 : i32
    %c0_i32_0 = arith.constant 0 : i32
    return %arg0, %c0_i32 : i32, i32
  }
}

</mosaic_0001>

<bundles_post_ra>
// kernel: tpu_custom_call.1
= control target key start
LH: loop header
LB: loop body
LE: loop exit
PB: predicated region body
PF: predicated region fallthrough
CT: control target
= control target key end

     0   :  { %vm44_vm0 = vcmask 130048   ;;  %v843_v3 = vmov 0.0   ;;  %vm521_vm1 = vcmask 1041408   ;;  %vm472_vm2 = vcmask 15360   ;;  %s1305_s4 = inlined_call_operand.vmem [shape: f32[16,288], index: 4, kind: input, shape index: {}]   ;;  %s1306_s1 = inlined_call_operand.vmem [shape: f32[128,16], index: 1, kind: input, shape index: {}]   ;;  %s1307_s2 = inlined_call_operand.vmem [shape: f32[2,18], index: 2, kind: input, shape index: {}]   ;;  %s1308_s0 = inlined_call_operand.vmem [shape: f32[128,2], index: 0, kind: input, shape index: {}]   ;;  %s1309_s6 = inlined_call_operand.vmem [shape: f32[128,288], index: 6, kind: output, shape index: {1}]   ;;  %s1310_s3 = inlined_call_operand.vmem [shape: f32[1,18], index: 3, kind: input, shape index: {}]   ;;  %s1311_s5 = inlined_call_operand.vmem [shape: f32[128,18], index: 5, kind: output, shape index: {0}]  }
   0x1   :  { %v40_v0 = vld [vmem:[%s1305_s4 + $0x10] sm:$0xff]  ;;  %v43_v1 = vld [vmem:[%s1305_s4 + $0x28] sm:$0xff]  ;;  %157 = vmatprep.mubr.f32.mxu0 %v843_v3  ;;  %v42_v5 = vld [vmem:[%s1305_s4 + $0x20] sm:$0xff]  ;;  %vm401_vm3 = vcmask 261120   ;;  %vm670_vm4 = vcmask 146432  }
   0x2   :  { %v39_v2 = vld [vmem:[%s1305_s4 + $0x8] sm:$0xff]  ;;  %v838_v4 = vpack.c.bf16 %v43_v1, %v40_v0  ;;  %v38_v6 = vld [vmem:[%s1305_s4] sm:$0xff]  ;;  %v41_v7 = vld [vmem:[%s1305_s4 + $0x18] sm:$0xff] }
   0x3   :  { %v834_v8 = vpack.c.bf16 %v42_v5, %v39_v2  ;;  %v836_v9 = vpack.c.bf16 %v41_v7, %v38_v6  ;;  %v22_v10 = vld [vmem:[%s1306_s1] sm:$0xff]  ;;  %v23_v12 = vld [vmem:[%s1306_s1 + $0x8] sm:$0xff]  ;;  %v24_v13 = vld [vmem:[%s1306_s1 + $0x10] sm:$0xff] }
   0x4   :  { %v464_v11 = vld [vmem:[%s1307_s2] sm:$0x3]  ;;  %839 = vmatprep.subr.bf16.mxu1 %v838_v4  ;;  %784 = vmatprep.mubr.msk.f32.mxu1 %vm44_vm0, %v22_v10  ;;  %v25_v14 = vld [vmem:[%s1306_s1 + $0x18] sm:$0xff]  ;;  %v27_v16 = vld [vmem:[%s1306_s1 + $0x28] sm:$0xff] }
   0x5   :  { %841 = vmatpush3.bf16.msra.mxu1 %v838_v4  ;;  %835 = vmatprep.subr.bf16.mxu0 %v834_v8  ;;  %v26_v15 = vld [vmem:[%s1306_s1 + $0x20] sm:$0xff]  ;;  %v28_v17 = vld [vmem:[%s1306_s1 + $0x30] sm:$0xff]  ;;  %v29_v18 = vld [vmem:[%s1306_s1 + $0x38] sm:$0xff] }
   0x6   :  { %837 = vmatpush1.bf16.msra.mxu0 %v836_v9  ;;  %808 = vmatprep.subr.msk.mxu1 %vm521_vm1, %v464_v11  ;;  %v30_v19 = vld [vmem:[%s1306_s1 + $0x40] sm:$0xff]  ;;  %v31_v20 = vld [vmem:[%s1306_s1 + $0x48] sm:$0xff]  ;;  %v32_v21 = vld [vmem:[%s1306_s1 + $0x50] sm:$0xff] }
   0x7   :  { %v33_v22 = vld [vmem:[%s1306_s1 + $0x58] sm:$0xff]  ;;  %v34_v23 = vld [vmem:[%s1306_s1 + $0x60] sm:$0xff]  ;;  %v35_v24 = vld [vmem:[%s1306_s1 + $0x68] sm:$0xff] }
   0x8   :  { %785 = vmatmul.mubr.msk.f32.vlgmr.msra.gmra.mrb[0].mxu1 %vm44_vm0, %v23_v12  ;;  %v36_v25 = vld [vmem:[%s1306_s1 + $0x70] sm:$0xff]  ;;  %v37_v26 = vld [vmem:[%s1306_s1 + $0x78] sm:$0xff]  ;;  %v448_v27 = vld [vmem:[%s1308_s0] sm:$0xff] }
   0x9   :  { %809 = vmatpush3.msk.msra.mxu1 %vm521_vm1, %v464_v11  ;;  %695 = vmatmul.mubr.msk.f32.vlgmr.msra.gmra.mrb[0].mxu0 %vm44_vm0, %v22_v10  ;;  %v449_v28 = vld [vmem:[%s1308_s0 + $0x8] sm:$0xff]  ;;  %v450_v29 = vld [vmem:[%s1308_s0 + $0x10] sm:$0xff]  ;;  %v451_v30 = vld [vmem:[%s1308_s0 + $0x18] sm:$0xff] }
   0xa   :  { %787 = vmatprep.mubr.msk.f32.mxu1 %vm44_vm0, %v24_v13  ;;  %163 = vmatprep.mubr.f32.mxu0 %v843_v3  ;;  %v452_v31 = vld [vmem:[%s1308_s0 + $0x20] sm:$0xff]  ;;  %v453_v32 = vld [vmem:[%s1308_s0 + $0x28] sm:$0xff]  ;;  %v454_v33 = vld [vmem:[%s1308_s0 + $0x30] sm:$0xff] }
   0xb   :  { %v455_v34 = vld [vmem:[%s1308_s0 + $0x38] sm:$0xff]  ;;  %v456_v35 = vld [vmem:[%s1308_s0 + $0x40] sm:$0xff]  ;;  %v457_v36 = vld [vmem:[%s1308_s0 + $0x48] sm:$0xff] }
   0xc   :  { %788 = vmatmul.mubr.msk.f32.gmra.mrb[2].mxu1 %vm44_vm0, %v25_v14  ;;  %v458_v37 = vld [vmem:[%s1308_s0 + $0x50] sm:$0xff]  ;;  %v459_v38 = vld [vmem:[%s1308_s0 + $0x58] sm:$0xff]  ;;  %v460_v39 = vld [vmem:[%s1308_s0 + $0x60] sm:$0xff] }
   0xd   :  { %696 = vmatmul.mubr.msk.f32.gmra.mrb[2].mxu0 %vm44_vm0, %v23_v12  ;;  %790 = vmatprep.mubr.msk.f32.mxu1 %vm44_vm0, %v26_v15  ;;  %v461_v40 = vld [vmem:[%s1308_s0 + $0x68] sm:$0xff]  ;;  %v462_v41 = vld [vmem:[%s1308_s0 + $0x70] sm:$0xff]  ;;  %v463_v42 = vld [vmem:[%s1308_s0 + $0x78] sm:$0xff] }
   0xe   :  { %169 = vmatprep.mubr.f32.mxu0 %v843_v3  ;;  %v1172_v11 = vld [vmem:[%s1310_s3] ss:$0 sm:$0xff] }
  0x10   :  { %791 = vmatmul.mubr.msk.f32.gmra.mrb[4].mxu1 %vm44_vm0, %v27_v16 }
  0x11   :  { %697 = vmatmul.mubr.msk.f32.gmra.mrb[4].mxu0 %vm44_vm0, %v24_v13  ;;  %793 = vmatprep.mubr.msk.f32.mxu1 %vm44_vm0, %v28_v17 }
  0x12   :  { %175 = vmatprep.mubr.f32.mxu0 %v843_v3 }
  0x14   :  { %794 = vmatmul.mubr.msk.f32.gmra.mrb[6].mxu1 %vm44_vm0, %v29_v18 }
  0x15   :  { %698 = vmatmul.mubr.msk.f32.gmra.mrb[6].mxu0 %vm44_vm0, %v25_v14  ;;  %796 = vmatprep.mubr.msk.f32.mxu1 %vm44_vm0, %v30_v19 }
  0x16   :  { %181 = vmatprep.mubr.f32.mxu0 %v843_v3 }
  0x18   :  { %797 = vmatmul.mubr.msk.f32.gmra.mrb[8].mxu1 %vm44_vm0, %v31_v20 }
  0x19   :  { %699 = vmatmul.mubr.msk.f32.gmra.mrb[8].mxu0 %vm44_vm0, %v26_v15  ;;  %799 = vmatprep.mubr.msk.f32.mxu1 %vm44_vm0, %v32_v21 }
  0x1a   :  { %187 = vmatprep.mubr.f32.mxu0 %v843_v3 }
  0x1c   :  { %800 = vmatmul.mubr.msk.f32.gmra.mrb[10].mxu1 %vm44_vm0, %v33_v22 }
  0x1d   :  { %700 = vmatmul.mubr.msk.f32.gmra.mrb[10].mxu0 %vm44_vm0, %v27_v16  ;;  %802 = vmatprep.mubr.msk.f32.mxu1 %vm44_vm0, %v34_v23 }
  0x1e   :  { %193 = vmatprep.mubr.f32.mxu0 %v843_v3 }
  0x20   :  { %803 = vmatmul.mubr.msk.f32.gmra.mrb[12].mxu1 %vm44_vm0, %v35_v24 }
  0x21   :  { %701 = vmatmul.mubr.msk.f32.gmra.mrb[12].mxu0 %vm44_vm0, %v28_v17  ;;  %805 = vmatprep.mubr.msk.f32.mxu1 %vm44_vm0, %v36_v25 }
  0x22   :  { %199 = vmatprep.mubr.f32.mxu0 %v843_v3 }
  0x24   :  { %806 = vmatmul.mubr.msk.f32.gmra.mrb[14].mxu1 %vm44_vm0, %v37_v26 }
  0x25   :  { %702 = vmatmul.mubr.msk.f32.gmra.mrb[14].mxu0 %vm44_vm0, %v29_v18  ;;  %810 = vmatprep.mubr.msk.f32.mxu1 %vm472_vm2, %v448_v27 }
  0x26   :  { %205 = vmatprep.mubr.f32.mxu0 %v843_v3 }
  0x28   :  { %811 = vmatmul.mubr.msk.f32.vlgmr.msra.gmra.mrb[16].mxu1 %vm472_vm2, %v449_v28 }
  0x29   :  { %703 = vmatmul.mubr.msk.f32.gmra.mrb[16].mxu0 %vm44_vm0, %v30_v19  ;;  %813 = vmatprep.mubr.msk.f32.mxu1 %vm472_vm2, %v450_v29 }
  0x2a   :  { %211 = vmatprep.mubr.f32.mxu0 %v843_v3 }
  0x2c   :  { %814 = vmatmul.mubr.msk.f32.gmra.mrb[18].mxu1 %vm472_vm2, %v451_v30 }
  0x2d   :  { %704 = vmatmul.mubr.msk.f32.gmra.mrb[18].mxu0 %vm44_vm0, %v31_v20  ;;  %816 = vmatprep.mubr.msk.f32.mxu1 %vm472_vm2, %v452_v31 }
  0x2e   :  { %217 = vmatprep.mubr.f32.mxu0 %v843_v3 }
  0x30   :  { %817 = vmatmul.mubr.msk.f32.gmra.mrb[20].mxu1 %vm472_vm2, %v453_v32 }
  0x31   :  { %705 = vmatmul.mubr.msk.f32.gmra.mrb[20].mxu0 %vm44_vm0, %v32_v21  ;;  %819 = vmatprep.mubr.msk.f32.mxu1 %vm472_vm2, %v454_v33 }
  0x32   :  { %223 = vmatprep.mubr.f32.mxu0 %v843_v3 }
  0x34   :  { %820 = vmatmul.mubr.msk.f32.gmra.mrb[22].mxu1 %vm472_vm2, %v455_v34 }
  0x35   :  { %706 = vmatmul.mubr.msk.f32.gmra.mrb[22].mxu0 %vm44_vm0, %v33_v22  ;;  %822 = vmatprep.mubr.msk.f32.mxu1 %vm472_vm2, %v456_v35 }
  0x36   :  { %229 = vmatprep.mubr.f32.mxu0 %v843_v3 }
  0x38   :  { %823 = vmatmul.mubr.msk.f32.gmra.mrb[24].mxu1 %vm472_vm2, %v457_v36 }
  0x39   :  { %707 = vmatmul.mubr.msk.f32.gmra.mrb[24].mxu0 %vm44_vm0, %v34_v23  ;;  %825 = vmatprep.mubr.msk.f32.mxu1 %vm472_vm2, %v458_v37 }
  0x3a   :  { %235 = vmatprep.mubr.f32.mxu0 %v843_v3 }
  0x3c   :  { %826 = vmatmul.mubr.msk.f32.gmra.mrb[26].mxu1 %vm472_vm2, %v459_v38 }
  0x3d   :  { %708 = vmatmul.mubr.msk.f32.gmra.mrb[26].mxu0 %vm44_vm0, %v35_v24  ;;  %828 = vmatprep.mubr.msk.f32.mxu1 %vm472_vm2, %v460_v39 }
  0x3e   :  { %241 = vmatprep.mubr.f32.mxu0 %v843_v3 }
  0x40   :  { %829 = vmatmul.mubr.msk.f32.gmra.mrb[28].mxu1 %vm472_vm2, %v461_v40 }
  0x41   :  { %709 = vmatmul.mubr.msk.f32.gmra.mrb[28].mxu0 %vm44_vm0, %v36_v25  ;;  %831 = vmatprep.mubr.msk.f32.mxu1 %vm472_vm2, %v462_v41 }
  0x42   :  { %247 = vmatprep.mubr.f32.mxu0 %v843_v3 }
  0x44   :  { %832 = vmatmul.mubr.msk.f32.gmra.mrb[30].mxu1 %vm472_vm2, %v463_v42 }
  0x45   :  { %710 = vmatmul.mubr.msk.f32.gmra.mrb[30].mxu0 %vm44_vm0, %v37_v26 }
  0xdb   :  { %v786_v43 = vpop.f32.mrb[0].mxu1 }
  0xdc   :  { %405 = vst.msk [vmem:[%s1309_s6 + $0x28] sm:$0xff] %vm401_vm3, %v786_v43  ;;  %v320_v44 = vpop.f32.mrb[1].mxu1  ;;  %v159_v45 = vpop.f32.mrb[0].mxu0 }
  0xdd   :  { %402 = vst.msk [vmem:[%s1309_s6 + $0x10] sm:$0xff] %vm401_vm3, %v320_v44  ;;  %399 = vst [vmem:[%s1309_s6] sm:$0xff] %v159_v45  ;;  %v161_v46 = vpop.f32.mrb[1].mxu0 }
  0xde   :  { %400 = vst [vmem:[%s1309_s6 + $0x8] sm:$0xff] %v161_v46 }
  0xdf   :  { %v789_v47 = vpop.f32.mrb[2].mxu1 }
  0xe0   :  { %411 = vst.msk [vmem:[%s1309_s6 + $0x58] sm:$0xff] %vm401_vm3, %v789_v47  ;;  %v330_v48 = vpop.f32.mrb[3].mxu1  ;;  %v165_v49 = vpop.f32.mrb[2].mxu0 }
  0xe1   :  { %408 = vst.msk [vmem:[%s1309_s6 + $0x40] sm:$0xff] %vm401_vm3, %v330_v48  ;;  %403 = vst [vmem:[%s1309_s6 + $0x18] sm:$0xff] %v165_v49  ;;  %v167_v50 = vpop.f32.mrb[3].mxu0 }
  0xe2   :  { %404 = vst [vmem:[%s1309_s6 + $0x20] sm:$0xff] %v167_v50 }
  0xe3   :  { %v792_v51 = vpop.f32.mrb[4].mxu1 }
  0xe4   :  { %417 = vst.msk [vmem:[%s1309_s6 + $0x88] sm:$0xff] %vm401_vm3, %v792_v51  ;;  %v340_v52 = vpop.f32.mrb[5].mxu1  ;;  %v171_v53 = vpop.f32.mrb[4].mxu0 }
  0xe5   :  { %414 = vst.msk [vmem:[%s1309_s6 + $0x70] sm:$0xff] %vm401_vm3, %v340_v52  ;;  %406 = vst [vmem:[%s1309_s6 + $0x30] sm:$0xff] %v171_v53  ;;  %v173_v54 = vpop.f32.mrb[5].mxu0 }
  0xe6   :  { %407 = vst [vmem:[%s1309_s6 + $0x38] sm:$0xff] %v173_v54 }
  0xe7   :  { %v795_v55 = vpop.f32.mrb[6].mxu1 }
  0xe8   :  { %423 = vst.msk [vmem:[%s1309_s6 + $0xb8] sm:$0xff] %vm401_vm3, %v795_v55  ;;  %v350_v56 = vpop.f32.mrb[7].mxu1  ;;  %v177_v57 = vpop.f32.mrb[6].mxu0 }
  0xe9   :  { %420 = vst.msk [vmem:[%s1309_s6 + $0xa0] sm:$0xff] %vm401_vm3, %v350_v56  ;;  %409 = vst [vmem:[%s1309_s6 + $0x48] sm:$0xff] %v177_v57  ;;  %v179_v58 = vpop.f32.mrb[7].mxu0 }
  0xea   :  { %410 = vst [vmem:[%s1309_s6 + $0x50] sm:$0xff] %v179_v58 }
  0xeb   :  { %v798_v59 = vpop.f32.mrb[8].mxu1 }
  0xec   :  { %429 = vst.msk [vmem:[%s1309_s6 + $0xe8] sm:$0xff] %vm401_vm3, %v798_v59  ;;  %v360_v60 = vpop.f32.mrb[9].mxu1  ;;  %v183_v61 = vpop.f32.mrb[8].mxu0 }
  0xed   :  { %426 = vst.msk [vmem:[%s1309_s6 + $0xd0] sm:$0xff] %vm401_vm3, %v360_v60  ;;  %412 = vst [vmem:[%s1309_s6 + $0x60] sm:$0xff] %v183_v61  ;;  %v185_v62 = vpop.f32.mrb[9].mxu0 }
  0xee   :  { %413 = vst [vmem:[%s1309_s6 + $0x68] sm:$0xff] %v185_v62 }
  0xef   :  { %v801_v63 = vpop.f32.mrb[10].mxu1 }
  0xf0   :  { %435 = vst.msk [vmem:[%s1309_s6 + $0x118] sm:$0xff] %vm401_vm3, %v801_v63  ;;  %v370_v0 = vpop.f32.mrb[11].mxu1  ;;  %v189_v1 = vpop.f32.mrb[10].mxu0 }
  0xf1   :  { %432 = vst.msk [vmem:[%s1309_s6 + $0x100] sm:$0xff] %vm401_vm3, %v370_v0  ;;  %415 = vst [vmem:[%s1309_s6 + $0x78] sm:$0xff] %v189_v1  ;;  %v191_v2 = vpop.f32.mrb[11].mxu0 }
  0xf2   :  { %416 = vst [vmem:[%s1309_s6 + $0x80] sm:$0xff] %v191_v2 }
  0xf3   :  { %v804_v3 = vpop.f32.mrb[12].mxu1 }
  0xf4   :  { %441 = vst.msk [vmem:[%s1309_s6 + $0x148] sm:$0xff] %vm401_vm3, %v804_v3  ;;  %v380_v4 = vpop.f32.mrb[13].mxu1  ;;  %v195_v5 = vpop.f32.mrb[12].mxu0 }
  0xf5   :  { %438 = vst.msk [vmem:[%s1309_s6 + $0x130] sm:$0xff] %vm401_vm3, %v380_v4  ;;  %418 = vst [vmem:[%s1309_s6 + $0x90] sm:$0xff] %v195_v5  ;;  %v197_v6 = vpop.f32.mrb[13].mxu0 }
  0xf6   :  { %419 = vst [vmem:[%s1309_s6 + $0x98] sm:$0xff] %v197_v6 }
  0xf7   :  { %v807_v7 = vpop.f32.mrb[14].mxu1 }
  0xf8   :  { %447 = vst.msk [vmem:[%s1309_s6 + $0x178] sm:$0xff] %vm401_vm3, %v807_v7  ;;  %v390_v8 = vpop.f32.mrb[15].mxu1  ;;  %v201_v9 = vpop.f32.mrb[14].mxu0 }
  0xf9   :  { %444 = vst.msk [vmem:[%s1309_s6 + $0x160] sm:$0xff] %vm401_vm3, %v390_v8  ;;  %421 = vst [vmem:[%s1309_s6 + $0xa8] sm:$0xff] %v201_v9  ;;  %v203_v10 = vpop.f32.mrb[15].mxu0 }
  0xfa   :  { %422 = vst [vmem:[%s1309_s6 + $0xb0] sm:$0xff] %v203_v10 }
  0xfb   :  { %v812_v12 = vpop.f32.mrb[16].mxu1 }
  0xfc   :  { %v597_v13 = vadd.f32 %v812_v12, %v1172_v11  ;;  %v591_v14 = vpop.f32.mrb[17].mxu1  ;;  %v207_v15 = vpop.f32.mrb[16].mxu0 }
  0xfd   :  { %v592_v16 = vadd.f32 %v1172_v11, %v591_v14  ;;  %424 = vst [vmem:[%s1309_s6 + $0xc0] sm:$0xff] %v207_v15  ;;  %v209_v17 = vpop.f32.mrb[17].mxu0 }
  0xfe   :  { %672 = vst.msk [vmem:[%s1311_s5 + $0x8] sm:$0xff] %vm670_vm4, %v597_v13  ;;  %425 = vst [vmem:[%s1309_s6 + $0xc8] sm:$0xff] %v209_v17 }
  0xff   :  { %671 = vst.msk [vmem:[%s1311_s5] sm:$0xff] %vm670_vm4, %v592_v16  ;;  %v815_v18 = vpop.f32.mrb[18].mxu1 }
 0x100   :  { %v607_v19 = vadd.f32 %v815_v18, %v1172_v11  ;;  %v601_v20 = vpop.f32.mrb[19].mxu1  ;;  %v213_v21 = vpop.f32.mrb[18].mxu0 }
 0x101   :  { %v602_v22 = vadd.f32 %v1172_v11, %v601_v20  ;;  %427 = vst [vmem:[%s1309_s6 + $0xd8] sm:$0xff] %v213_v21  ;;  %v215_v23 = vpop.f32.mrb[19].mxu0 }
 0x102   :  { %674 = vst.msk [vmem:[%s1311_s5 + $0x18] sm:$0xff] %vm670_vm4, %v607_v19  ;;  %428 = vst [vmem:[%s1309_s6 + $0xe0] sm:$0xff] %v215_v23 }
 0x103   :  { %673 = vst.msk [vmem:[%s1311_s5 + $0x10] sm:$0xff] %vm670_vm4, %v602_v22  ;;  %v818_v24 = vpop.f32.mrb[20].mxu1 }
 0x104   :  { %v617_v25 = vadd.f32 %v818_v24, %v1172_v11  ;;  %v611_v26 = vpop.f32.mrb[21].mxu1  ;;  %v219_v27 = vpop.f32.mrb[20].mxu0 }
 0x105   :  { %v612_v28 = vadd.f32 %v1172_v11, %v611_v26  ;;  %430 = vst [vmem:[%s1309_s6 + $0xf0] sm:$0xff] %v219_v27  ;;  %v221_v29 = vpop.f32.mrb[21].mxu0 }
 0x106   :  { %676 = vst.msk [vmem:[%s1311_s5 + $0x28] sm:$0xff] %vm670_vm4, %v617_v25  ;;  %431 = vst [vmem:[%s1309_s6 + $0xf8] sm:$0xff] %v221_v29 }
 0x107   :  { %675 = vst.msk [vmem:[%s1311_s5 + $0x20] sm:$0xff] %vm670_vm4, %v612_v28  ;;  %v821_v30 = vpop.f32.mrb[22].mxu1 }
 0x108   :  { %v627_v31 = vadd.f32 %v821_v30, %v1172_v11  ;;  %v621_v32 = vpop.f32.mrb[23].mxu1  ;;  %v225_v33 = vpop.f32.mrb[22].mxu0 }
 0x109   :  { %v622_v34 = vadd.f32 %v1172_v11, %v621_v32  ;;  %433 = vst [vmem:[%s1309_s6 + $0x108] sm:$0xff] %v225_v33  ;;  %v227_v35 = vpop.f32.mrb[23].mxu0 }
 0x10a   :  { %678 = vst.msk [vmem:[%s1311_s5 + $0x38] sm:$0xff] %vm670_vm4, %v627_v31  ;;  %434 = vst [vmem:[%s1309_s6 + $0x110] sm:$0xff] %v227_v35 }
 0x10b   :  { %677 = vst.msk [vmem:[%s1311_s5 + $0x30] sm:$0xff] %vm670_vm4, %v622_v34  ;;  %v824_v36 = vpop.f32.mrb[24].mxu1 }
 0x10c   :  { %v637_v37 = vadd.f32 %v824_v36, %v1172_v11  ;;  %v631_v38 = vpop.f32.mrb[25].mxu1  ;;  %v231_v39 = vpop.f32.mrb[24].mxu0 }
 0x10d   :  { %v632_v40 = vadd.f32 %v1172_v11, %v631_v38  ;;  %436 = vst [vmem:[%s1309_s6 + $0x120] sm:$0xff] %v231_v39  ;;  %v233_v41 = vpop.f32.mrb[25].mxu0 }
 0x10e   :  { %680 = vst.msk [vmem:[%s1311_s5 + $0x48] sm:$0xff] %vm670_vm4, %v637_v37  ;;  %437 = vst [vmem:[%s1309_s6 + $0x128] sm:$0xff] %v233_v41 }
 0x10f   :  { %679 = vst.msk [vmem:[%s1311_s5 + $0x40] sm:$0xff] %vm670_vm4, %v632_v40  ;;  %v827_v42 = vpop.f32.mrb[26].mxu1 }
 0x110   :  { %v647_v43 = vadd.f32 %v827_v42, %v1172_v11  ;;  %v641_v44 = vpop.f32.mrb[27].mxu1  ;;  %v237_v45 = vpop.f32.mrb[26].mxu0 }
 0x111   :  { %v642_v46 = vadd.f32 %v1172_v11, %v641_v44  ;;  %439 = vst [vmem:[%s1309_s6 + $0x138] sm:$0xff] %v237_v45  ;;  %v239_v47 = vpop.f32.mrb[27].mxu0 }
 0x112   :  { %682 = vst.msk [vmem:[%s1311_s5 + $0x58] sm:$0xff] %vm670_vm4, %v647_v43  ;;  %440 = vst [vmem:[%s1309_s6 + $0x140] sm:$0xff] %v239_v47 }
 0x113   :  { %681 = vst.msk [vmem:[%s1311_s5 + $0x50] sm:$0xff] %vm670_vm4, %v642_v46  ;;  %v830_v48 = vpop.f32.mrb[28].mxu1 }
 0x114   :  { %v657_v49 = vadd.f32 %v830_v48, %v1172_v11  ;;  %v651_v50 = vpop.f32.mrb[29].mxu1  ;;  %v243_v51 = vpop.f32.mrb[28].mxu0 }
 0x115   :  { %v652_v52 = vadd.f32 %v1172_v11, %v651_v50  ;;  %442 = vst [vmem:[%s1309_s6 + $0x150] sm:$0xff] %v243_v51  ;;  %v245_v53 = vpop.f32.mrb[29].mxu0 }
 0x116   :  { %684 = vst.msk [vmem:[%s1311_s5 + $0x68] sm:$0xff] %vm670_vm4, %v657_v49  ;;  %443 = vst [vmem:[%s1309_s6 + $0x158] sm:$0xff] %v245_v53 }
 0x117   :  { %683 = vst.msk [vmem:[%s1311_s5 + $0x60] sm:$0xff] %vm670_vm4, %v652_v52  ;;  %v833_v54 = vpop.f32.mrb[30].mxu1 }
 0x118   :  { %v667_v55 = vadd.f32 %v833_v54, %v1172_v11  ;;  %v661_v56 = vpop.f32.mrb[31].mxu1  ;;  %v249_v57 = vpop.f32.mrb[30].mxu0 }
 0x119   :  { %v662_v58 = vadd.f32 %v1172_v11, %v661_v56  ;;  %445 = vst [vmem:[%s1309_s6 + $0x168] sm:$0xff] %v249_v57  ;;  %v251_v59 = vpop.f32.mrb[31].mxu0 }
 0x11a   :  { %686 = vst.msk [vmem:[%s1311_s5 + $0x78] sm:$0xff] %vm670_vm4, %v667_v55  ;;  %446 = vst [vmem:[%s1309_s6 + $0x170] sm:$0xff] %v251_v59 }
 0x11b   :  { %685 = vst.msk [vmem:[%s1311_s5 + $0x70] sm:$0xff] %vm670_vm4, %v662_v58 }

</bundles_post_ra>
